<compile_context>
chip_gen: v5e
topology: v5e:2x2
jax: 0.10.0
libtpu: 0.0.40
codegen_flags: <defaults>
</compile_context>

<pallas_src>
import jax
import jax.numpy as jnp
from jax.experimental import pallas as pl
from jax.experimental.pallas import tpu as pltpu


def _conv_matmul_kernel(p_ref, w_ref, b_ref, o_ref):
    """One grid step = one TILE_M slab of im2col rows.

    p_ref: (TILE_M, K_PAD)     bf16 patch rows            (VMEM)
    w_ref: (K_PAD, COUT_PAD)   bf16 flattened weights     (VMEM, resident)
    b_ref: (1, COUT_PAD)       f32 bias                   (VMEM, resident)
    o_ref: (TILE_M, COUT_PAD)  f32 output (lane-dense)    (VMEM)
    """
    acc = jnp.dot(p_ref[...], w_ref[...], preferred_element_type=jnp.float32)
    o_ref[...] = (acc + b_ref[...]).astype(o_ref.dtype)


def _round_up(x, m):
    return ((x + m - 1) // m) * m


def tudui_forward(x_nchw, w_oihw, bias, *, tile_m=256):
    """Forward pass matching PyTorch's nn.Conv2d(3, 64, kernel_size=3)."""
    n, cin, h, w = x_nchw.shape
    cout, cin_w, kh, kw = w_oihw.shape
    assert cin == cin_w
    oh, ow = h - kh + 1, w - kw + 1

    k = kh * kw * cin                       # 27
    k_pad = _round_up(k, 32)                # 32: clean bf16 sublane packing
    cout_pad = _round_up(cout, 128)         # 128: lane-dense output stores

    m = n * oh * ow                         # batch flattened into GEMM M
    tile_m = max(8, min(tile_m, _round_up(m, 8)))   # multiple of 8, sane for tiny M
    m_pad = _round_up(m, tile_m)
    num_tiles = m_pad // tile_m

    # ---- layout glue (plain JAX, outside the kernel) ----
    x_nhwc = jnp.transpose(x_nchw, (0, 2, 3, 1))                  # (N, H, W, Cin)
    # im2col: tap order (kh, kw, cin) matches the weight flattening below.
    taps = [x_nhwc[:, i:i + oh, j:j + ow, :]
            for i in range(kh) for j in range(kw)]
    patches = jnp.concatenate(taps, axis=-1).reshape(m, k)        # (M, 27)
    patches = jnp.pad(patches, ((0, m_pad - m), (0, k_pad - k)))
    patches = patches.astype(jnp.bfloat16)                        # MXU fast path

    w_flat = jnp.transpose(w_oihw, (2, 3, 1, 0)).reshape(k, cout)  # (27, Cout)
    w_pad = jnp.pad(w_flat, ((0, k_pad - k), (0, cout_pad - cout)))
    w_pad = w_pad.astype(jnp.bfloat16)
    b_pad = jnp.pad(bias, (0, cout_pad - cout)).reshape(1, cout_pad)
    b_pad = b_pad.astype(jnp.float32)

    bytes_accessed = (
        m_pad * k_pad * 2            # patches (bf16)
        + k_pad * cout_pad * 2       # weights (bf16)
        + cout_pad * 4               # bias (f32)
        + m_pad * cout_pad * 4       # output (f32)
    )

    out = pl.pallas_call(
        _conv_matmul_kernel,
        out_shape=jax.ShapeDtypeStruct((m_pad, cout_pad), jnp.float32),
        grid_spec=pltpu.PrefetchScalarGridSpec(
            num_scalar_prefetch=0,
            grid=(num_tiles,),  # M-tile axis: megacore-shardable on v7x
            in_specs=[
                pl.BlockSpec((tile_m, k_pad), lambda i: (i, 0)),
                pl.BlockSpec((k_pad, cout_pad), lambda i: (0, 0)),   # resident
                pl.BlockSpec((1, cout_pad), lambda i: (0, 0)),       # resident
            ],
            out_specs=pl.BlockSpec((tile_m, cout_pad), lambda i: (i, 0)),
        ),
        compiler_params=pltpu.CompilerParams(
            dimension_semantics=("parallel",),
            vmem_limit_bytes=32 * 1024 * 1024,
        ),
        cost_estimate=pl.CostEstimate(
            flops=2 * m_pad * k_pad * cout_pad,
            transcendentals=0,
            bytes_accessed=bytes_accessed,
        ),
    )(patches, w_pad, b_pad)

    # Drop pad rows / pad channels and go back to PyTorch's NCHW.
    out = out[:m, :cout].reshape(n, oh, ow, cout)
    return jnp.transpose(out, (0, 3, 1, 2)).astype(x_nchw.dtype)


if __name__ == "__main__":
    key = jax.random.PRNGKey(0)
    k_x, k_w, k_b = jax.random.split(key, 3)

    # Module-implied shapes: Conv2d(3, 64, kernel_size=3); small input.
    N, CIN, H, W = 2, 3, 16, 16
    COUT, KH, KW = 64, 3, 3

    x = jax.random.normal(k_x, (N, CIN, H, W), dtype=jnp.float32)

    # Deterministic init mimicking PyTorch's default uniform(-1/sqrt(fan_in), ...).
    fan_in = CIN * KH * KW
    bound = 1.0 / (fan_in ** 0.5)
    w = jax.random.uniform(
        k_w, (COUT, CIN, KH, KW), dtype=jnp.float32, minval=-bound, maxval=bound
    )
    b = jax.random.uniform(
        k_b, (COUT,), dtype=jnp.float32, minval=-bound, maxval=bound
    )

    out = jax.block_until_ready(tudui_forward(x, w, b))
    assert out.shape == (N, COUT, H - KH + 1, W - KW + 1), out.shape

    # Reference: same bf16-rounded inputs through XLA's f32-precision conv, so
    # the check isolates the kernel's conv math from the intentional bf16 cast.
    x_q = x.astype(jnp.bfloat16).astype(jnp.float32)
    w_q = w.astype(jnp.bfloat16).astype(jnp.float32)
    ref = jax.lax.conv_general_dilated(
        x_q, w_q, window_strides=(1, 1), padding="VALID",
        dimension_numbers=("NCHW", "OIHW", "NCHW"),
        precision=jax.lax.Precision.HIGHEST,
    ) + b.reshape(1, COUT, 1, 1)
    assert jnp.allclose(out, ref, atol=1e-3, rtol=1e-3), float(
        jnp.max(jnp.abs(out - ref))
    )

    print("KERNEL_OK")
</pallas_src>

<mosaic_0001>
module attributes {stable_mosaic.version = 11 : i64} {
  func.func @_conv_matmul_kernel(%arg0: i32, %arg1: memref<256x32xbf16, #tpu.memory_space<vmem>>, %arg2: memref<32x128xbf16, #tpu.memory_space<vmem>>, %arg3: memref<1x128xf32, #tpu.memory_space<vmem>>, %arg4: memref<256x128xf32, #tpu.memory_space<vmem>>) attributes {dimension_semantics = [#tpu.dimension_semantics<parallel>], iteration_bounds = array<i64: 2>, scalar_prefetch = 0 : i64, scratch_operands = 0 : i64, tpu.core_type = #tpu.core_type<tc>, window_params = [{transform_indices = @transform_0, window_bounds = array<i64: 256, 32>}, {pipeline_mode = #tpu.pipeline_mode<synchronous>, transform_indices = @transform_1, window_bounds = array<i64: 32, 128>}, {pipeline_mode = #tpu.pipeline_mode<synchronous>, transform_indices = @transform_2, window_bounds = array<i64: 1, 128>}, {transform_indices = @transform_3, window_bounds = array<i64: 256, 128>}]} {
    %c0 = arith.constant 0 : index
    %c0_0 = arith.constant 0 : index
    %0 = vector.load %arg1[%c0, %c0_0] : memref<256x32xbf16, #tpu.memory_space<vmem>>, vector<256x32xbf16>
    %c0_1 = arith.constant 0 : index
    %c0_2 = arith.constant 0 : index
    %1 = vector.load %arg2[%c0_1, %c0_2] : memref<32x128xbf16, #tpu.memory_space<vmem>>, vector<32x128xbf16>
    %cst = arith.constant dense<0.000000e+00> : vector<256x128xf32>
    %2 = tpu.matmul %0, %1, %cst {dimension_numbers = #tpu.dot_dimension_numbers<[1], [0], [0], [1], [0, 0, 1, 1], [], []>} : vector<256x32xbf16>, vector<32x128xbf16>, vector<256x128xf32> -> vector<256x128xf32>
    %c0_3 = arith.constant 0 : index
    %c0_4 = arith.constant 0 : index
    %3 = vector.load %arg3[%c0_3, %c0_4] : memref<1x128xf32, #tpu.memory_space<vmem>>, vector<1x128xf32>
    %4 = vector.broadcast %3 : vector<1x128xf32> to vector<256x128xf32>
    %5 = arith.addf %2, %4 : vector<256x128xf32>
    %c0_5 = arith.constant 0 : index
    %c0_6 = arith.constant 0 : index
    %6 = vector.load %arg4[%c0_5, %c0_6] : memref<256x128xf32, #tpu.memory_space<vmem>>, vector<256x128xf32>
    tpu.vector_store %arg4[%c0_5, %c0_6], %5 {strides = array<i32>} : memref<256x128xf32, #tpu.memory_space<vmem>>, vector<256x128xf32>,
    return
  }
  func.func @transform_0(%arg0: i32) -> (i32, i32) {
    %c0_i32 = arith.constant 0 : i32
    %c0_i32_0 = arith.constant 0 : i32
    return %arg0, %c0_i32 : i32, i32
  }
  func.func @transform_1(%arg0: i32) -> (i32, i32) {
    %c0_i32 = arith.constant 0 : i32
    %c0_i32_0 = arith.constant 0 : i32
    %c0_i32_1 = arith.constant 0 : i32
    return %c0_i32, %c0_i32_0 : i32, i32
  }
  func.func @transform_2(%arg0: i32) -> (i32, i32) {
    %c0_i32 = arith.constant 0 : i32
    %c0_i32_0 = arith.constant 0 : i32
    %c0_i32_1 = arith.constant 0 : i32
    return %c0_i32, %c0_i32_0 : i32, i32
  }
  func.func @transform_3(%arg0: i32) -> (i32, i32) {
    %c0_i32 = arith.constant 0 : i32
    %c0_i32_0 = arith.constant 0 : i32
    return %arg0, %c0_i32 : i32, i32
  }
}

</mosaic_0001>

<bundles_post_ra>
// kernel: tpu_custom_call.1
= control target key start
LH: loop header
LB: loop body
LE: loop exit
PB: predicated region body
PF: predicated region fallthrough
CT: control target
= control target key end

     0   :  { %8 = vsyncpa [#allocation3], 0  ;;  %s1006_s0 = inlined_call_operand.vmem [shape: bf16[512,32], index: 0, kind: input, shape index: {}]   ;;  %s1007_s1 = inlined_call_operand.vmem [shape: bf16[32,128], index: 1, kind: input, shape index: {}]   ;;  %s1008_s2 = inlined_call_operand.vmem [shape: f32[1,128], index: 2, kind: input, shape index: {}]   ;;  %s1009_s3 = inlined_call_operand.hbm [shape: f32[512,128], index: 3, kind: output, shape index: {}]  }
   0x1   :  { %10 = vsyncpa [#allocation3 + $0x1], 0  ;;  %s806_s12 = smov 0   ;;  %s808_s13 = smov 0  }
   0x2   :  { %s810_s14 = smov 0   ;;  %s812_s15 = smov 0  }
   0x3 LB: > { %s827_s16 = sadd.s32 4294967295, %s782_s15   ;;  %s553_s17 = sadd.s32 4294967294, %s782_s15   ;;  %s782_s15 = sphi %s812_s15, %s1015_s15   ;;  %s778_s14 = sphi %s810_s14, %s1014_s14   ;;  %s774_s13 = sphi %s808_s13, %s1013_s13   ;;  %s770_s12 = sphi %s806_s12, %s1012_s12  }
   0x4   : > { %s831_s18 = sadd.s32 1, %s782_s15   ;;  %s91_s19 = sadd.s32 1, %s778_s14 }
   0x5   : > { %s88_s20 = ssub.s32 %s782_s15, %s831_s18  ;;  %p101_p0 = scmp.ne.s32.totalorder %s778_s14, %s774_s13 }
   0x6   : > { %p89_p1 = scmp.eq.s32.totalorder %s88_s20, 0  ;;  %p102_p2 = scmp.eq.s32.totalorder %s827_s16, 1 }
   0x7   : > { %p107_p3 = scmp.ne.s32.totalorder %s774_s13, %s770_s12  ;;  %p108_p4 = scmp.eq.s32.totalorder %s553_s17, 1 }
   0x8   : > { %s842_s21 = scalar_select %p89_p1, %s778_s14, %s91_s19  }
   0x9   : > { %p844_p5 = por %p102_p2, %p101_p0  ;;  %p848_p6 = por %p108_p4, %p107_p3 }
   0xa   : > { %p556_p7 = scmp.ge.s32.totalorder %s782_s15, 1  ;;  %p141_p8 = scmp.lt.s32.totalorder %s782_s15, 3 }
   0xc   : > { %p142_p9 = pnand %p556_p7, %p141_p8 }
   0xd   : > { %s558_s26 = sshll.u32 (!%p142_p9), %s827_s16, 5  ;;  %s162_s6 = sand.u32 (!%p142_p9), 1, %s774_s13  }
   0xe   : > { %145 = sbr.rel (%p142_p9) target bundleno = 223 (0xdf), region = 32  ;;  %p166_p10 = scmp.lt.s32.totalorder (!%p142_p9), %s558_s26, 63 }
   0xf   : > { %s557_s7 = sshll.u32 (!%p142_p9), %s162_s6, 8  ;;  %s671_s11 = sshll.u32 (!%p142_p9), %s827_s16, 8 }
  0x10   : > { %s908_s10 = scalar_lea.vmem (!%p142_p9), [#allocation2], %s557_s7  ;;  %s487_s20 = scalar_lea.hbm (!%p142_p9), %s1009_s3, %s671_s11 }
  0x11   : > { %s488_s16 = sshll.u32 (!%p142_p9), %s908_s10, 4  ;;  %s490_s24 = sshll.u32 (!%p142_p9), %s487_s20, 4  ;;  %s489_s16 = int_to_ptr.vmem [resolvable:$true] %s488_s16  ;;  %s491_s24 = int_to_ptr.hbm [resolvable:$true] %s490_s24 }
  0x12   : > { %s476_s25 = scalar_lea.sflag (!%p142_p9), [#allocation3], %s162_s6  ;;  %s740_s30 = scalar_lea.hbm (!%p142_p9), %s1009_s3, 512 }
  0x13   : > { %v670_v0 = vld [vmem:[%s1007_s1 + $0x8] sm:$0xff]  ;;  %v669_v1 = vld [vmem:[%s1007_s1] sm:$0xff]  ;;  %s1017_s26 = smov (!%p166_p10, %s558_s26), 63  ;;  %vm305_vm0 = vcmask 261120  }
  0x14   : > { %360 = vmatpush.bf16.msra.mxu0 %v670_v0  ;;  %672 = vmatpush.bf16.msra.mxu1 %v670_v0  ;;  %s559_s29 = sshll.u32 %s1017_s26, 2  ;;  %v904_v18 = vld [vmem:[%s1008_s2] ss:$0 sm:$0xff]  ;;  %s734_s26 = sshra.s32 %s491_s24, 4  ;;  %s735_s26 = int_to_ptr.hbm [resolvable:$true] %s734_s26 }
  0x15   : > { %673 = vmatpush.bf16.msra.mxu2 %v670_v0  ;;  %674 = vmatpush.bf16.msra.mxu3 %v670_v0  ;;  %s864_s5 = scalar_lea.vmem %s1006_s0, %s559_s29  ;;  %s736_s27 = scalar_lea.hbm %s735_s26, 256 }
  0x16   : > { %v653_v2 = vld [vmem:[%s864_s5] sm:$0xff]  ;;  %v654_v6 = vld [vmem:[%s864_s5 + $0x8] sm:$0xff]  ;;  %v655_v10 = vld [vmem:[%s864_s5 + $0x10] sm:$0xff]  ;;  %p737_p11 = scmp.ne.s32.totalorder %s735_s26, %s736_s27  ;;  %p741_p0 = scmp.lt.s32.totalorder %s735_s26, %s1009_s3 }
  0x17   : > { %v657_v3 = vld [vmem:[%s864_s5 + $0x20] sm:$0xff]  ;;  %v658_v7 = vld [vmem:[%s864_s5 + $0x28] sm:$0xff]  ;;  %v659_v11 = vld [vmem:[%s864_s5 + $0x30] sm:$0xff]  ;;  %p742_p1 = scmp.lt.s32.totalorder %s740_s30, %s736_s27 }
  0x18   : > { %361 = vmatpush.bf16.msra.mxu0 %v669_v1  ;;  %675 = vmatpush.bf16.msra.mxu1 %v669_v1  ;;  %v661_v4 = vld [vmem:[%s864_s5 + $0x40] sm:$0xff]  ;;  %v662_v8 = vld [vmem:[%s864_s5 + $0x48] sm:$0xff]  ;;  %v663_v12 = vld [vmem:[%s864_s5 + $0x50] sm:$0xff]  ;;  %p738_p12 = pnand %p737_p11, %p844_p5 }
  0x19   : > { %676 = vmatpush.bf16.msra.mxu2 %v669_v1  ;;  %677 = vmatpush.bf16.msra.mxu3 %v669_v1  ;;  %v665_v5 = vld [vmem:[%s864_s5 + $0x60] sm:$0xff]  ;;  %v666_v9 = vld [vmem:[%s864_s5 + $0x68] sm:$0xff]  ;;  %v667_v13 = vld [vmem:[%s864_s5 + $0x70] sm:$0xff]  ;;  %p743_p2 = por %p742_p1, %p741_p0 }
  0x1a   : > { %v656_v14 = vld [vmem:[%s864_s5 + $0x18] sm:$0xff]  ;;  %p739_p13 = pneg %p738_p12 }
  0x1b   : > { %632 = vmatmul.msk.bf16.vlgmr.msra.gmra.mxu0 %vm305_vm0, %v653_v2  ;;  %636 = vmatmul.msk.bf16.vlgmr.msra.gmra.mxu1 %vm305_vm0, %v657_v3  ;;  %v660_v15 = vld [vmem:[%s864_s5 + $0x38] sm:$0xff] }
  0x1c   : > { %640 = vmatmul.msk.bf16.vlgmr.msra.gmra.mxu2 %vm305_vm0, %v661_v4  ;;  %644 = vmatmul.msk.bf16.vlgmr.msra.gmra.mxu3 %vm305_vm0, %v665_v5  ;;  %v664_v16 = vld [vmem:[%s864_s5 + $0x58] sm:$0xff]  ;;  %p744_p3 = pnand %p743_p2, %p739_p13 }
  0x1d   : > { %v668_v17 = vld [vmem:[%s864_s5 + $0x78] sm:$0xff] }
  0x2b   : > { %633 = vmatmul.msk.bf16.gmra.mxu0 %vm305_vm0, %v654_v6  ;;  %637 = vmatmul.msk.bf16.gmra.mxu1 %vm305_vm0, %v658_v7 }
  0x2c   : > { %641 = vmatmul.msk.bf16.gmra.mxu2 %vm305_vm0, %v662_v8  ;;  %645 = vmatmul.msk.bf16.gmra.mxu3 %vm305_vm0, %v666_v9 }
  0x3b   : > { %634 = vmatmul.msk.bf16.gmra.mxu0 %vm305_vm0, %v655_v10  ;;  %638 = vmatmul.msk.bf16.gmra.mxu1 %vm305_vm0, %v659_v11 }
  0x3c   : > { %642 = vmatmul.msk.bf16.gmra.mxu2 %vm305_vm0, %v663_v12  ;;  %646 = vmatmul.msk.bf16.gmra.mxu3 %vm305_vm0, %v667_v13 }
  0x4b   : > { %635 = vmatmul.msk.bf16.gmra.mxu0 %vm305_vm0, %v656_v14  ;;  %639 = vmatmul.msk.bf16.gmra.mxu1 %vm305_vm0, %v660_v15 }
  0x4c   : > { %643 = vmatmul.msk.bf16.gmra.mxu2 %vm305_vm0, %v664_v16  ;;  %647 = vmatmul.msk.bf16.gmra.mxu3 %vm305_vm0, %v668_v17 }
  0x98   : > { %v363_v19 = vpop.f32.mrf.mxu0  ;;  %v383_v20 = vpop.f32.mrf.mxu1 }
  0x99   : > { %v364_v21 = vadd.f32 %v904_v18, %v363_v19  ;;  %v384_v22 = vadd.f32 %v904_v18, %v383_v20 }
  0x9b   : > { %443 = vst [vmem:[%s908_s10] sm:$0xff] %v364_v21 }
  0x9c   : > { %451 = vst [vmem:[%s908_s10 + $0x40] sm:$0xff] %v384_v22 }
  0x9f   : > { %v403_v23 = vpop.f32.mrf.mxu2  ;;  %v423_v24 = vpop.f32.mrf.mxu3 }
  0xa0   : > { %v404_v25 = vadd.f32 %v904_v18, %v403_v23  ;;  %v424_v26 = vadd.f32 %v904_v18, %v423_v24  ;;  %v365_v27 = vpop.f32.mrf.mxu0  ;;  %v385_v28 = vpop.f32.mrf.mxu1 }
  0xa1   : > { %v366_v29 = vadd.f32 %v904_v18, %v365_v27  ;;  %v386_v30 = vadd.f32 %v904_v18, %v385_v28 }
  0xa2   : > { %459 = vst [vmem:[%s908_s10 + $0x80] sm:$0xff] %v404_v25 }
  0xa3   : > { %467 = vst [vmem:[%s908_s10 + $0xc0] sm:$0xff] %v424_v26 }
  0xa4   : > { %444 = vst [vmem:[%s908_s10 + $0x8] sm:$0xff] %v366_v29 }
  0xa5   : > { %452 = vst [vmem:[%s908_s10 + $0x48] sm:$0xff] %v386_v30 }
  0xa7   : > { %v405_v31 = vpop.f32.mrf.mxu2  ;;  %v425_v32 = vpop.f32.mrf.mxu3 }
  0xa8   : > { %v406_v33 = vadd.f32 %v904_v18, %v405_v31  ;;  %v426_v34 = vadd.f32 %v904_v18, %v425_v32  ;;  %v368_v35 = vpop.f32.mrf.mxu0  ;;  %v388_v36 = vpop.f32.mrf.mxu1 }
  0xa9   : > { %v369_v37 = vadd.f32 %v904_v18, %v368_v35  ;;  %v389_v38 = vadd.f32 %v904_v18, %v388_v36 }
  0xaa   : > { %460 = vst [vmem:[%s908_s10 + $0x88] sm:$0xff] %v406_v33 }
  0xab   : > { %468 = vst [vmem:[%s908_s10 + $0xc8] sm:$0xff] %v426_v34 }
  0xac   : > { %445 = vst [vmem:[%s908_s10 + $0x10] sm:$0xff] %v369_v37 }
  0xad   : > { %453 = vst [vmem:[%s908_s10 + $0x50] sm:$0xff] %v389_v38 }
  0xaf   : > { %v408_v39 = vpop.f32.mrf.mxu2  ;;  %v428_v40 = vpop.f32.mrf.mxu3 }
  0xb0   : > { %v409_v41 = vadd.f32 %v904_v18, %v408_v39  ;;  %v429_v42 = vadd.f32 %v904_v18, %v428_v40  ;;  %v370_v43 = vpop.f32.mrf.mxu0  ;;  %v390_v44 = vpop.f32.mrf.mxu1 }
  0xb1   : > { %v371_v45 = vadd.f32 %v904_v18, %v370_v43  ;;  %v391_v46 = vadd.f32 %v904_v18, %v390_v44 }
  0xb2   : > { %461 = vst [vmem:[%s908_s10 + $0x90] sm:$0xff] %v409_v41 }
  0xb3   : > { %469 = vst [vmem:[%s908_s10 + $0xd0] sm:$0xff] %v429_v42 }
  0xb4   : > { %446 = vst [vmem:[%s908_s10 + $0x18] sm:$0xff] %v371_v45 }
  0xb5   : > { %454 = vst [vmem:[%s908_s10 + $0x58] sm:$0xff] %v391_v46 }
  0xb7   : > { %v410_v47 = vpop.f32.mrf.mxu2  ;;  %v430_v48 = vpop.f32.mrf.mxu3 }
  0xb8   : > { %v411_v49 = vadd.f32 %v904_v18, %v410_v47  ;;  %v431_v50 = vadd.f32 %v904_v18, %v430_v48  ;;  %v373_v51 = vpop.f32.mrf.mxu0  ;;  %v393_v52 = vpop.f32.mrf.mxu1 }
  0xb9   : > { %v374_v53 = vadd.f32 %v904_v18, %v373_v51  ;;  %v394_v54 = vadd.f32 %v904_v18, %v393_v52 }
  0xba   : > { %462 = vst [vmem:[%s908_s10 + $0x98] sm:$0xff] %v411_v49 }
  0xbb   : > { %470 = vst [vmem:[%s908_s10 + $0xd8] sm:$0xff] %v431_v50 }
  0xbc   : > { %447 = vst [vmem:[%s908_s10 + $0x20] sm:$0xff] %v374_v53 }
  0xbd   : > { %455 = vst [vmem:[%s908_s10 + $0x60] sm:$0xff] %v394_v54 }
  0xbf   : > { %v413_v55 = vpop.f32.mrf.mxu2  ;;  %v433_v56 = vpop.f32.mrf.mxu3 }
  0xc0   : > { %v414_v57 = vadd.f32 %v904_v18, %v413_v55  ;;  %v434_v58 = vadd.f32 %v904_v18, %v433_v56  ;;  %v375_v59 = vpop.f32.mrf.mxu0  ;;  %v395_v60 = vpop.f32.mrf.mxu1 }
  0xc1   : > { %v376_v61 = vadd.f32 %v904_v18, %v375_v59  ;;  %v396_v62 = vadd.f32 %v904_v18, %v395_v60 }
  0xc2   : > { %463 = vst [vmem:[%s908_s10 + $0xa0] sm:$0xff] %v414_v57 }
  0xc3   : > { %471 = vst [vmem:[%s908_s10 + $0xe0] sm:$0xff] %v434_v58 }
  0xc4   : > { %448 = vst [vmem:[%s908_s10 + $0x28] sm:$0xff] %v376_v61 }
  0xc5   : > { %456 = vst [vmem:[%s908_s10 + $0x68] sm:$0xff] %v396_v62 }
  0xc7   : > { %v415_v63 = vpop.f32.mrf.mxu2  ;;  %v435_v0 = vpop.f32.mrf.mxu3 }
  0xc8   : > { %v416_v1 = vadd.f32 %v904_v18, %v415_v63  ;;  %v436_v2 = vadd.f32 %v904_v18, %v435_v0  ;;  %v378_v3 = vpop.f32.mrf.mxu0  ;;  %v398_v4 = vpop.f32.mrf.mxu1 }
  0xc9   : > { %v379_v5 = vadd.f32 %v904_v18, %v378_v3  ;;  %v399_v6 = vadd.f32 %v904_v18, %v398_v4 }
  0xca   : > { %464 = vst [vmem:[%s908_s10 + $0xa8] sm:$0xff] %v416_v1 }
  0xcb   : > { %472 = vst [vmem:[%s908_s10 + $0xe8] sm:$0xff] %v436_v2 }
  0xcc   : > { %449 = vst [vmem:[%s908_s10 + $0x30] sm:$0xff] %v379_v5 }
  0xcd   : > { %457 = vst [vmem:[%s908_s10 + $0x70] sm:$0xff] %v399_v6 }
  0xcf   : > { %v418_v7 = vpop.f32.mrf.mxu2  ;;  %v438_v8 = vpop.f32.mrf.mxu3 }
  0xd0   : > { %v419_v9 = vadd.f32 %v904_v18, %v418_v7  ;;  %v439_v10 = vadd.f32 %v904_v18, %v438_v8  ;;  %v380_v11 = vpop.f32.mrf.mxu0  ;;  %v400_v12 = vpop.f32.mrf.mxu1 }
  0xd1   : > { %v381_v13 = vadd.f32 %v904_v18, %v380_v11  ;;  %v401_v14 = vadd.f32 %v904_v18, %v400_v12 }
  0xd2   : > { %465 = vst [vmem:[%s908_s10 + $0xb0] sm:$0xff] %v419_v9 }
  0xd3   : > { %473 = vst [vmem:[%s908_s10 + $0xf0] sm:$0xff] %v439_v10 }
  0xd4   : > { %450 = vst [vmem:[%s908_s10 + $0x38] sm:$0xff] %v381_v13 }
  0xd5   : > { %458 = vst [vmem:[%s908_s10 + $0x78] sm:$0xff] %v401_v14 }
  0xd7   : > { %v420_v15 = vpop.f32.mrf.mxu2  ;;  %v440_v16 = vpop.f32.mrf.mxu3 }
  0xd8   : > { %v421_v17 = vadd.f32 %v904_v18, %v420_v15  ;;  %v441_v19 = vadd.f32 %v904_v18, %v440_v16 }
  0xda   : > { %466 = vst [vmem:[%s908_s10 + $0xb8] sm:$0xff] %v421_v17 }
  0xdb   : > { %474 = vst [vmem:[%s908_s10 + $0xf8] sm:$0xff] %v441_v19 }
  0xdc   : > { %747 = shalt.err (!%p744_p3)
}
  0xdd   : > { %s784_s6 = smov 128   ;;  %s785_s7 = smov 8  }
  0xde   : > { %678 = dma.vmem_to_hbm [thread:$0]  (%p844_p5), %s489_s16, 4096, %s491_s24, %s476_s25, %s784_s6, %s784_s6, %s785_s7  }
  0xdf PF: > { %p684_p4 = scmp.ge.s32.totalorder %s782_s15, 2  ;;  %s505_s8 = sand.u32 1, %s770_s12  }
  0xe0   : > { %s506_s9 = scalar_lea.sflag [#allocation3], %s505_s8 }
  0xe1   : > { %p681_p7 = pnand %p684_p4, %p848_p6 }
  0xe3   : > { %p682_p8 = pneg %p681_p7 }
  0xe5   : > { %765 = dma.done.wait (%p682_p8), %s506_s9, 4096  }
  0xe6   : > { %767 = vsyncadd (%p682_p8), %s506_s9, 4294963200  ;;  %p13_p9 = scmp.ge.s32.totalorder %s831_s18, 4   ;;  %s1012_s12 = smov %s774_s13 }
  0xe7   : > { %s1013_s13 = smov %s778_s14  ;;  %s1014_s14 = smov %s842_s21 }
  0xe8   : > { %s1015_s15 = smov %s831_s18  ;;  %15 = sbr.rel (!%p13_p9) target bundleno = 3 (0x3), region = 67 }
  0xed   :  { %512 = vsyncpa [#allocation3], 1 }
  0xee   :  { %514 = vsyncpa [#allocation3 + $0x1], 1 }

</bundles_post_ra>
